<compile_context>
chip_gen: v7x
topology: tpu7x:2x2x1
jax: 0.10.0
libtpu: 0.0.40
codegen_flags: <defaults>
</compile_context>

<pallas_src>
import functools

import jax
import jax.numpy as jnp
from jax.experimental import pallas as pl
from jax.experimental.pallas import tpu as pltpu

# Deterministic module "parameters" (the weights of the combined wrappers).
W_CE = 1.0     # weight for LossWrapper 0 (cross-entropy on 'y')
W_MSE = 0.5    # weight for LossWrapper 1 (masked MSE on 'value')

NUM_CORES = 2  # leading "parallel" grid axis -> sharded across v7x's 2 TCs
LANES = 128
SCAL_COLS = 4  # packed per-row scalar columns: [y, v_pred, v_tgt, keep]


def _round_up(x, m):
    return ((x + m - 1) // m) * m


def _vmem_budget_bytes():
    """Half of physical VMEM: 64 MiB on v5e/v6e (128 MiB), 32 MiB on v7x (64 MiB)."""
    try:
        cap = pltpu.get_tpu_info().vmem_capacity_bytes
    except Exception:
        cap = 64 * 1024 * 1024
    return cap // 2


def _combined_loss_kernel(logits_ref, scal_ref, out_ref, *, m_total):
    """Grid = (core, row-tile).  The (1, 8, 128) output block is resident across
    the trailing 'arbitrary' axis and is used directly as the accumulator:
      out[c, 0, 0] = sum of per-row cross-entropy terms handled by core c
      out[c, 1, 0] = sum of masked squared errors handled by core c
      out[c, 2, 0] = number of non-terminated (and valid) rows handled by core c
    Rows beyond m_total (ragged last block / clamped extra grid steps) are
    masked out via an in-kernel validity check, so no wrapper-side padding is
    needed.
    """
    i = pl.program_id(1)

    @pl.when(i == 0)
    def _init():
        out_ref[...] = jnp.zeros_like(out_ref)

    logits = logits_ref[...].astype(jnp.float32)   # [TM, C], upcast in-kernel (VPU)
    tm, c = logits.shape
    scal = scal_ref[...]                           # [TM, 4] f32, one DMA per step

    y = scal[:, 0:1].astype(jnp.int32)             # class targets
    v = scal[:, 1:2]                               # value predictions
    t = scal[:, 2:3]                               # value targets
    keep = scal[:, 3:4]                            # 1.0 where ~terminated

    # Validity of each row w.r.t. the *unclamped* global row index vs static M.
    row_start = (pl.program_id(0) * pl.num_programs(1) + i) * tm
    row_idx = row_start + jax.lax.broadcasted_iota(jnp.int32, (tm, 1), 0)
    valid = row_idx < m_total                      # [tm, 1] bool

    # --- cross-entropy: log(sum(exp(shifted))) - shifted[target] per valid row ---
    m = jnp.max(logits, axis=-1, keepdims=True)
    shifted = logits - m                           # reused by exp AND the gather
    sumexp = jnp.sum(jnp.exp(shifted), axis=-1, keepdims=True)
    cls_idx = jax.lax.broadcasted_iota(jnp.int32, (1, c), 1)   # (1, C), broadcast vs y
    tgt_shifted = jnp.sum(jnp.where(cls_idx == y, shifted, 0.0),
                          axis=-1, keepdims=True)
    ce_row = jnp.log(sumexp) - tgt_shifted         # the +m / -m cancel
    ce_tile = jnp.sum(jnp.where(valid, ce_row, 0.0))

    # --- masked MSE on value head (mask = valid & ~terminated) ---
    sq = (v - t) ** 2
    mask = jnp.logical_and(valid, keep > 0.5)
    mse_tile = jnp.sum(jnp.where(mask, sq, 0.0))
    cnt_tile = jnp.sum(jnp.where(mask, 1.0, 0.0))

    # Accumulate into the lane-dense resident output block (rows 0..2, lane 0 read back).
    row = jax.lax.broadcasted_iota(jnp.int32, (8, LANES), 0)
    part = (jnp.where(row == 0, ce_tile, 0.0)
            + jnp.where(row == 1, mse_tile, 0.0)
            + jnp.where(row == 2, cnt_tile, 0.0))
    out_ref[...] += part[None].astype(out_ref.dtype)


def combined_losses(out, data, *, tile_rows=None, vmem_limit_bytes=None):
    """JAX/Pallas equivalent of the combined LossWrapper forward(out, data).

    out  : tuple (logits [B, N, C] (any float dtype), values [B, N])
    data : dict with 'y' [B, N] int, 'value' [B, N] float, 'terminated' [B, N] bool
    """
    logits, values = out
    B, N, C = logits.shape
    M = B * N
    assert C < (1 << 24), "class ids round-trip through f32; exact only for C < 2**24"
    itemsize = jnp.dtype(logits.dtype).itemsize

    sub = max(8, 32 // max(1, itemsize))       # native sublane multiple (16 for bf16)
    c_pad = _round_up(C, LANES)                # VMEM lane padding of the logits tile

    budget = int(_vmem_budget_bytes() if vmem_limit_bytes is None else vmem_limit_bytes)

    if tile_rows is None:
        # Per-row VMEM cost: double-buffered native-dtype logits + packed scalars
        # (both lane-padded in VMEM) + ~3x f32 tile working set for the in-kernel
        # upcast / shifted / exp intermediates.
        bytes_per_row = c_pad * (2 * itemsize + 3 * 4) + 2 * LANES * 4
        fixed = 2 * 8 * LANES * 4 + (1 << 20)  # output block + slack
        t = max(sub, (budget - fixed) * 3 // 4 // bytes_per_row)
        rows_per_core = _round_up(pl.cdiv(M, NUM_CORES), sub)
        t = min(t, rows_per_core)
        tile_rows = max(sub, (t // sub) * sub)

    steps_per_core = pl.cdiv(M, NUM_CORES * tile_rows)
    last_block = pl.cdiv(M, tile_rows) - 1     # last (possibly ragged) real block

    # Stream logits in their native dtype; NO padding copy in HBM.
    logits2 = logits.reshape(M, C)

    # Pack per-row scalars into ONE [M, 4] f32 array -> single small DMA per step.
    y_f = data['y'].reshape(M).astype(jnp.float32)
    v_f = values.reshape(M).astype(jnp.float32)
    t_f = data['value'].reshape(M).astype(jnp.float32)
    keep = (~data['terminated']).reshape(M).astype(jnp.float32)
    scal = jnp.stack([y_f, v_f, t_f, keep], axis=1)

    def row_block(cidx, i):
        # Clamp so grid steps past the end of the array re-read the last real
        # block; the in-kernel validity mask (global row index vs M) zeroes them.
        return (jnp.minimum(cidx * steps_per_core + i, last_block), 0)

    partials = pl.pallas_call(
        functools.partial(_combined_loss_kernel, m_total=M),
        out_shape=jax.ShapeDtypeStruct((NUM_CORES, 8, LANES), jnp.float32),
        grid_spec=pltpu.PrefetchScalarGridSpec(
            num_scalar_prefetch=0,
            grid=(NUM_CORES, steps_per_core),
            in_specs=[
                pl.BlockSpec((tile_rows, C), row_block),          # logits tile
                pl.BlockSpec((tile_rows, SCAL_COLS), row_block),  # packed scalars
            ],
            out_specs=pl.BlockSpec((1, 8, LANES), lambda cidx, i: (cidx, 0, 0)),
        ),
        compiler_params=pltpu.CompilerParams(
            dimension_semantics=("parallel", "arbitrary"),
            vmem_limit_bytes=budget,
        ),
    )(logits2, scal)

    ce_sum = jnp.sum(partials[:, 0, 0])
    mse_sum = jnp.sum(partials[:, 1, 0])
    cnt = jnp.sum(partials[:, 2, 0])
    ce_mean = ce_sum / M                 # CE denominator is the static row count
    mse_mean = mse_sum / cnt             # NaN if every row terminated (matches torch)
    return W_CE * ce_mean + W_MSE * mse_mean


def combined_losses_ref(out, data):
    """Pure-JAX reference reproducing the torch semantics."""
    logits, values = out
    B, N, C = logits.shape
    logits2 = logits.reshape(B * N, C).astype(jnp.float32)
    y = data['y'].reshape(B * N)
    logp = jax.nn.log_softmax(logits2, axis=-1)
    ce = -jnp.mean(jnp.take_along_axis(logp, y[:, None], axis=-1))
    v = values.reshape(B * N).astype(jnp.float32)
    t = data['value'].reshape(B * N).astype(jnp.float32)
    keep = ~data['terminated'].reshape(B * N)
    sq = (v - t) ** 2
    mse = jnp.sum(jnp.where(keep, sq, 0.0)) / jnp.sum(keep.astype(jnp.float32))
    return W_CE * ce + W_MSE * mse


if __name__ == "__main__":
    B, N, C = 2, 8, 8          # batch=2, agents=8, classes=8  -> M=16 rows
    key = jax.random.PRNGKey(0)
    k1, k2, k3, k4 = jax.random.split(key, 4)

    # bf16 logits exercise the native-dtype streaming path (upcast happens in-kernel).
    logits = jax.random.normal(k1, (B, N, C), dtype=jnp.float32).astype(jnp.bfloat16)
    values = jax.random.normal(k2, (B, N), dtype=jnp.float32)
    model_out = (logits, values)

    data = {
        'y': jax.random.randint(k3, (B, N), 0, C, dtype=jnp.int32),
        'value': jax.random.normal(k4, (B, N), dtype=jnp.float32),
        # deterministic termination pattern (guaranteed some non-terminated rows)
        'terminated': (jnp.arange(B * N).reshape(B, N) % 3) == 0,
    }

    loss = jax.block_until_ready(combined_losses(model_out, data))
    ref = jax.block_until_ready(combined_losses_ref(model_out, data))

    assert jnp.allclose(loss, ref, rtol=1e-5, atol=1e-5), (loss, ref)
    print("KERNEL_OK")
</pallas_src>

<mosaic_0001>
module attributes {stable_mosaic.version = 11 : i64} {
  func.func @_combined_loss_kernel(%arg0: i32, %arg1: i32, %arg2: memref<16x8xbf16, #tpu.memory_space<vmem>>, %arg3: memref<16x4xf32, #tpu.memory_space<vmem>>, %arg4: memref<1x8x128xf32, #tpu.memory_space<vmem>>) attributes {dimension_semantics = [#tpu.dimension_semantics<parallel>, #tpu.dimension_semantics<arbitrary>], iteration_bounds = array<i64: 2, 1>, scalar_prefetch = 0 : i64, scratch_operands = 0 : i64, tpu.core_type = #tpu.core_type<tc>, window_params = [{transform_indices = @transform_0, window_bounds = array<i64: 16, 8>}, {transform_indices = @transform_1, window_bounds = array<i64: 16, 4>}, {transform_indices = @transform_2, window_bounds = array<i64: 1, 8, 128>}]} {
    %c0_i32 = arith.constant 0 : i32
    %0 = arith.cmpi eq, %arg1, %c0_i32 : i32
    %1 = arith.extui %0 : i1 to i32
    %c0_i32_0 = arith.constant 0 : i32
    %2 = arith.cmpi ne, %1, %c0_i32_0 : i32
    scf.if %2 {
      %cst_27 = arith.constant 0.000000e+00 : f32
      %82 = vector.broadcast %cst_27 : f32 to vector<1x8x128xf32>
      %c0_28 = arith.constant 0 : index
      %c0_29 = arith.constant 0 : index
      %c0_30 = arith.constant 0 : index
      %83 = vector.load %arg4[%c0_28, %c0_29, %c0_30] : memref<1x8x128xf32, #tpu.memory_space<vmem>>, vector<1x8x128xf32>
      tpu.vector_store %arg4[%c0_28, %c0_29, %c0_30], %82 {strides = array<i32>} : memref<1x8x128xf32, #tpu.memory_space<vmem>>, vector<1x8x128xf32>,
    } else {
    }
    %c0 = arith.constant 0 : index
    %c0_1 = arith.constant 0 : index
    %3 = vector.load %arg2[%c0, %c0_1] : memref<16x8xbf16, #tpu.memory_space<vmem>>, vector<16x8xbf16>
    %4 = arith.extf %3 : vector<16x8xbf16> to vector<16x8xf32>
    %c0_2 = arith.constant 0 : index
    %c0_3 = arith.constant 0 : index
    %5 = vector.load %arg3[%c0_2, %c0_3] : memref<16x4xf32, #tpu.memory_space<vmem>>, vector<16x4xf32>
    %6 = vector.extract_strided_slice %5 {offsets = [0, 0], sizes = [16, 1], strides = [1, 1]} : vector<16x4xf32> to vector<16x1xf32>
    %7 = arith.fptosi %6 : vector<16x1xf32> to vector<16x1xi32>
    %8 = vector.extract_strided_slice %5 {offsets = [0, 1], sizes = [16, 1], strides = [1, 1]} : vector<16x4xf32> to vector<16x1xf32>
    %9 = vector.extract_strided_slice %5 {offsets = [0, 2], sizes = [16, 1], strides = [1, 1]} : vector<16x4xf32> to vector<16x1xf32>
    %10 = vector.extract_strided_slice %5 {offsets = [0, 3], sizes = [16, 1], strides = [1, 1]} : vector<16x4xf32> to vector<16x1xf32>
    %c1_i32 = arith.constant 1 : i32
    %11 = arith.muli %arg0, %c1_i32 : i32
    %12 = arith.addi %11, %arg1 : i32
    %c16_i32 = arith.constant 16 : i32
    %13 = arith.muli %12, %c16_i32 : i32
    %14 = tpu.iota {dimensions = array<i32: 0>} : vector<16x1xi32>
    %15 = vector.broadcast %13 : i32 to vector<16x1xi32>
    %16 = arith.addi %15, %14 : vector<16x1xi32>
    %c16_i32_4 = arith.constant 16 : i32
    %17 = vector.broadcast %c16_i32_4 : i32 to vector<16x1xi32>
    %18 = arith.cmpi slt, %16, %17 : vector<16x1xi32>
    %cst = arith.constant dense<0xFF800000> : vector<16xf32>
    %19 = vector.multi_reduction <maximumf>, %4, %cst [1] : vector<16x8xf32> to vector<16xf32>
    %20 = vector.shape_cast %19 : vector<16xf32> to vector<16x1xf32>
    %21 = vector.broadcast %20 : vector<16x1xf32> to vector<16x8xf32>
    %22 = arith.subf %4, %21 : vector<16x8xf32>
    %23 = math.exp %22 : vector<16x8xf32>
    %cst_5 = arith.constant dense<0.000000e+00> : vector<16xf32>
    %24 = vector.multi_reduction <add>, %23, %cst_5 [1] : vector<16x8xf32> to vector<16xf32>
    %25 = vector.shape_cast %24 : vector<16xf32> to vector<16x1xf32>
    %26 = tpu.iota {dimensions = array<i32: 1>} : vector<1x8xi32>
    %27 = vector.broadcast %26 : vector<1x8xi32> to vector<16x8xi32>
    %28 = vector.broadcast %7 : vector<16x1xi32> to vector<16x8xi32>
    %29 = arith.cmpi eq, %27, %28 : vector<16x8xi32>
    %cst_6 = arith.constant 0.000000e+00 : f32
    %30 = vector.broadcast %cst_6 : f32 to vector<16x8xf32>
    %31 = arith.select %29, %22, %30 : vector<16x8xi1>, vector<16x8xf32>
    %cst_7 = arith.constant dense<0.000000e+00> : vector<16xf32>
    %32 = vector.multi_reduction <add>, %31, %cst_7 [1] : vector<16x8xf32> to vector<16xf32>
    %33 = vector.shape_cast %32 : vector<16xf32> to vector<16x1xf32>
    %34 = math.log %25 : vector<16x1xf32>
    %35 = arith.subf %34, %33 : vector<16x1xf32>
    %cst_8 = arith.constant 0.000000e+00 : f32
    %36 = vector.broadcast %cst_8 : f32 to vector<16x1xf32>
    %37 = arith.select %18, %35, %36 : vector<16x1xi1>, vector<16x1xf32>
    %38 = vector.shape_cast %37 : vector<16x1xf32> to vector<1x16x1xf32>
    %cst_9 = arith.constant dense<0.000000e+00> : vector<1xf32>
    %39 = vector.multi_reduction <add>, %38, %cst_9 [1, 2] : vector<1x16x1xf32> to vector<1xf32>
    %40 = vector.shape_cast %39 : vector<1xf32> to vector<1x1x1xf32>
    %41 = vector.extract %40[0, 0, 0] : f32 from vector<1x1x1xf32>
    %42 = arith.subf %8, %9 : vector<16x1xf32>
    %43 = arith.mulf %42, %42 : vector<16x1xf32>
    %cst_10 = arith.constant 5.000000e-01 : f32
    %44 = vector.broadcast %cst_10 : f32 to vector<16x1xf32>
    %45 = arith.cmpf ogt, %10, %44 : vector<16x1xf32>
    %46 = arith.andi %18, %45 : vector<16x1xi1>
    %cst_11 = arith.constant 0.000000e+00 : f32
    %47 = vector.broadcast %cst_11 : f32 to vector<16x1xf32>
    %48 = arith.select %46, %43, %47 : vector<16x1xi1>, vector<16x1xf32>
    %49 = vector.shape_cast %48 : vector<16x1xf32> to vector<1x16x1xf32>
    %cst_12 = arith.constant dense<0.000000e+00> : vector<1xf32>
    %50 = vector.multi_reduction <add>, %49, %cst_12 [1, 2] : vector<1x16x1xf32> to vector<1xf32>
    %51 = vector.shape_cast %50 : vector<1xf32> to vector<1x1x1xf32>
    %52 = vector.extract %51[0, 0, 0] : f32 from vector<1x1x1xf32>
    %cst_13 = arith.constant 1.000000e+00 : f32
    %cst_14 = arith.constant 0.000000e+00 : f32
    %53 = vector.broadcast %cst_13 : f32 to vector<16x1xf32>
    %54 = vector.broadcast %cst_14 : f32 to vector<16x1xf32>
    %55 = arith.select %46, %53, %54 : vector<16x1xi1>, vector<16x1xf32>
    %56 = vector.shape_cast %55 : vector<16x1xf32> to vector<1x16x1xf32>
    %cst_15 = arith.constant dense<0.000000e+00> : vector<1xf32>
    %57 = vector.multi_reduction <add>, %56, %cst_15 [1, 2] : vector<1x16x1xf32> to vector<1xf32>
    %58 = vector.shape_cast %57 : vector<1xf32> to vector<1x1x1xf32>
    %59 = vector.extract %58[0, 0, 0] : f32 from vector<1x1x1xf32>
    %60 = tpu.iota {dimensions = array<i32: 0>} : vector<8x128xi32>
    %c0_i32_16 = arith.constant 0 : i32
    %61 = vector.broadcast %c0_i32_16 : i32 to vector<8x128xi32>
    %62 = arith.cmpi eq, %60, %61 : vector<8x128xi32>
    %cst_17 = arith.constant 0.000000e+00 : f32
    %63 = vector.broadcast %41 : f32 to vector<8x128xf32>
    %64 = vector.broadcast %cst_17 : f32 to vector<8x128xf32>
    %65 = arith.select %62, %63, %64 : vector<8x128xi1>, vector<8x128xf32>
    %c1_i32_18 = arith.constant 1 : i32
    %66 = vector.broadcast %c1_i32_18 : i32 to vector<8x128xi32>
    %67 = arith.cmpi eq, %60, %66 : vector<8x128xi32>
    %cst_19 = arith.constant 0.000000e+00 : f32
    %68 = vector.broadcast %52 : f32 to vector<8x128xf32>
    %69 = vector.broadcast %cst_19 : f32 to vector<8x128xf32>
    %70 = arith.select %67, %68, %69 : vector<8x128xi1>, vector<8x128xf32>
    %71 = arith.addf %65, %70 : vector<8x128xf32>
    %c2_i32 = arith.constant 2 : i32
    %72 = vector.broadcast %c2_i32 : i32 to vector<8x128xi32>
    %73 = arith.cmpi eq, %60, %72 : vector<8x128xi32>
    %cst_20 = arith.constant 0.000000e+00 : f32
    %74 = vector.broadcast %59 : f32 to vector<8x128xf32>
    %75 = vector.broadcast %cst_20 : f32 to vector<8x128xf32>
    %76 = arith.select %73, %74, %75 : vector<8x128xi1>, vector<8x128xf32>
    %77 = arith.addf %71, %76 : vector<8x128xf32>
    %c0_21 = arith.constant 0 : index
    %c0_22 = arith.constant 0 : index
    %c0_23 = arith.constant 0 : index
    %78 = vector.load %arg4[%c0_21, %c0_22, %c0_23] : memref<1x8x128xf32, #tpu.memory_space<vmem>>, vector<1x8x128xf32>
    %79 = vector.shape_cast %77 : vector<8x128xf32> to vector<1x8x128xf32>
    %80 = arith.addf %78, %79 : vector<1x8x128xf32>
    %c0_24 = arith.constant 0 : index
    %c0_25 = arith.constant 0 : index
    %c0_26 = arith.constant 0 : index
    %81 = vector.load %arg4[%c0_24, %c0_25, %c0_26] : memref<1x8x128xf32, #tpu.memory_space<vmem>>, vector<1x8x128xf32>
    tpu.vector_store %arg4[%c0_24, %c0_25, %c0_26], %80 {strides = array<i32>} : memref<1x8x128xf32, #tpu.memory_space<vmem>>, vector<1x8x128xf32>,
    return
  }
  func.func @transform_0(%arg0: i32, %arg1: i32) -> (i32, i32) {
    %c1_i32 = arith.constant 1 : i32
    %0 = arith.muli %arg0, %c1_i32 : i32
    %1 = arith.addi %0, %arg1 : i32
    %c0_i32 = arith.constant 0 : i32
    %2 = arith.minsi %1, %c0_i32 : i32
    %c0_i32_0 = arith.constant 0 : i32
    %c0_i32_1 = arith.constant 0 : i32
    return %2, %c0_i32_0 : i32, i32
  }
  func.func @transform_1(%arg0: i32, %arg1: i32) -> (i32, i32) {
    %c1_i32 = arith.constant 1 : i32
    %0 = arith.muli %arg0, %c1_i32 : i32
    %1 = arith.addi %0, %arg1 : i32
    %c0_i32 = arith.constant 0 : i32
    %2 = arith.minsi %1, %c0_i32 : i32
    %c0_i32_0 = arith.constant 0 : i32
    %c0_i32_1 = arith.constant 0 : i32
    return %2, %c0_i32_0 : i32, i32
  }
  func.func @transform_2(%arg0: i32, %arg1: i32) -> (i32, i32, i32) {
    %c0_i32 = arith.constant 0 : i32
    %c0_i32_0 = arith.constant 0 : i32
    %c0_i32_1 = arith.constant 0 : i32
    return %arg0, %c0_i32, %c0_i32_0 : i32, i32, i32
  }
}

</mosaic_0001>

<bundles_post_ra>
// kernel: tpu_custom_call.1
= control target key start
LH: loop header
LB: loop body
LE: loop exit
PB: predicated region body
PF: predicated region fallthrough
CT: control target
= control target key end

     0   :  { %7 = vsyncpa [#allocation3], 0  ;;  %s826_s0 = inlined_call_operand.vmem [shape: bf16[16,8], index: 0, kind: input, shape index: {}]   ;;  %s827_s1 = inlined_call_operand.vmem [shape: f32[16,4], index: 1, kind: input, shape index: {}]   ;;  %s828_s2 = inlined_call_operand.hbm [shape: f32[2,8,128], index: 2, kind: output, shape index: {}]  }
   0x1   :  { %9 = vsyncpa [#allocation3 + $0x1], 0  ;;  %s681_s9 = smov 0   ;;  %s683_s10 = smov 0  }
   0x2   :  { %s685_s11 = smov 0   ;;  %s687_s12 = smov 0  }
   0x3   :  { %s689_s13 = smov 0   ;;  %s691_s14 = smov 0  }
   0x4 LB: > { %s476_s15 = sadd.s32 4294967295, %s658_s14   ;;  %s477_s16 = sadd.s32 4294967294, %s658_s14   ;;  %s658_s14 = sphi %s691_s14, %s15_s14   ;;  %s654_s13 = sphi %s689_s13, %s835_s13   ;;  %s650_s12 = sphi %s687_s12, %s834_s12   ;;  %s646_s11 = sphi %s685_s11, %s833_s11   ;;  %s642_s10 = sphi %s683_s10, %s832_s10   ;;  %s638_s9 = sphi %s681_s9, %s831_s9  }
   0x5   : > { %s27_s17 = sadd.s32 1, %s654_s13  ;;  %s98_s18 = sadd.s32 1, %s646_s11 }
   0x6   : > { %p29_p0 = scmp.ge.s32.totalorder %s27_s17, 2  ;;  %p108_p1 = scmp.ne.s32.totalorder %s646_s11, %s642_s10 }
   0x7   : > { %p109_p2 = scmp.eq.s32.totalorder %s476_s15, 1  ;;  %p114_p3 = scmp.ne.s32.totalorder %s642_s10, %s638_s9 }
   0x8   : > { %s837_s17 = smov (%p29_p0, %s27_s17), 0  ;;  %p115_p5 = scmp.eq.s32.totalorder %s477_s16, 1 }
   0x9   : > { %p721_p4 = por %p109_p2, %p108_p1  ;;  %s95_s20 = ssub.s32 %s654_s13, %s837_s17 }
   0xa   : > { %p480_p6 = scmp.ge.s32.totalorder %s658_s14, 1  ;;  %p96_p7 = scmp.eq.s32.totalorder %s95_s20, 0 }
   0xb   : > { %p728_p8 = por %p115_p5, %p114_p3  ;;  %p163_p9 = scmp.lt.s32.totalorder %s658_s14, 3 }
   0xc   : > { %s734_s22 = scalar_select %p96_p7, %s646_s11, %s98_s18  }
   0xd   : > { %p164_p10 = pnand %p480_p6, %p163_p9 }
   0xe   : > { %p197_p11 = scmp.lt.s32.totalorder (!%p164_p10), %s650_s12, 0  ;;  %v660_v0 = vmov (!%p164_p10), 0   ;;  %vm243_vm0 = vcmask (!%p164_p10), 64512   ;;  %s661_s5 = smov (!%p164_p10), 127   ;;  %v235_v18 = vlaneseq (!%p164_p10)  ;;  %v663_v41 = vmov (!%p164_p10), 0.0  }
   0xf   : > { %167 = sbr.rel (%p164_p10) target bundleno = 614 (0x266), region = 28  ;;  %565 = vset.pattern.permute.xlu0 (!%p164_p10), %v660_v0  ;;  %566 = vset.pattern.permute.xlu1 (!%p164_p10), %v660_v0  ;;  %s662_s6 = smov (!%p164_p10), 2   ;;  %vm288_vm9 = vcmask (!%p164_p10), 7168  }
  0x10   : > { %v263_v19 = vand.u32 (!%p164_p10), 127, %v235_v18  ;;  %v755_v36 = vshrl.u32 (!%p164_p10), %v235_v18, 7  ;;  %s486_s7 = sshll.u32 (!%p164_p10), %s650_s12, 4  ;;  %s664_s8 = smov (!%p164_p10), 125  }
  0x11   : > { %v238_v38 = vstv (!%p164_p10), %s486_s7  ;;  %s193_s15 = sand.u32 (!%p164_p10), 1, %s642_s10  }
  0x12   : > { %v237_v37 = vadd.s32 (!%p164_p10), 8, %v755_v36  ;;  %v239_v40 = vadd.s32 (!%p164_p10), %v238_v38, %v755_v36  ;;  %vm372_vm10 = vcmp.eq.s32.totalorder (!%p164_p10), %v755_v36, 1  ;;  %s481_s20 = sshll.u32 (!%p164_p10), %s193_s15, 3  ;;  %vm369_vm11 = vcmp.eq.s32.totalorder (!%p164_p10), %v755_v36, 0  ;;  %s384_s30 = scalar_lea.sflag (!%p164_p10), [#allocation3], %s193_s15 }
  0x13   : > { %vm376_vm12 = vcmp.eq.s32.totalorder (!%p164_p10), %v755_v36, 2 }
  0x14   : > { %v240_v39 = vadd.s32 (!%p164_p10), %v238_v38, %v237_v37  ;;  %vm241_vm5 = vcmp.lt.s32.totalorder (!%p164_p10), %v239_v40, 16 }
  0x16   : > { %s198_s23 = scalar_select %p197_p11, %s650_s12, 0  ;;  %vm242_vm3 = vcmp.lt.s32.totalorder %v240_v39, 16 }
  0x18   : > { %s482_s24 = sshll.u32 %s198_s23, 1 }
  0x19   : > { %p200_p12 = scmp.lt.s32.totalorder %s482_s24, 1 }
  0x1b   : > { %s839_s24 = smov (!%p200_p12, %s482_s24), 1 }
  0x1c   : > { %s485_s25 = sshll.u32 %s839_s24, 3  ;;  %s483_s26 = sshll.u32 %s839_s24, 2 }
  0x1d   : > { %s215_s29 = scalar_lea.vmem %s827_s1, %s485_s25  ;;  %s203_s4 = scalar_lea.vmem %s826_s0, %s483_s26 }
  0x1e   : > { %v744_v1 = vld [vmem:[%s215_s29] sm:$0xff]  ;;  %v230_v6 = vld [vmem:[%s215_s29 + $0x8] sm:$0xff]  ;;  %s488_s24 = sshll.u32 %s650_s12, 7  ;;  %s195_s25 = scalar_lea.vmem [#allocation2], %s481_s20 }
  0x1f   : > { %v492_v2 = vld [vmem:[%s203_s4] sm:$0xff]   ;;  %303 = vrot.lane.b32.xlu0 %v744_v1, %s661_s5  ;;  %v495_v5 = vtrunc.f32 %v744_v1  ;;  %v497_v10 = vtrunc.f32 %v230_v6  ;;  %vm314_vm4 = vcmp.gt.f32.partialorder %v230_v6, 0.5  ;;  %vm313_vm6 = vcmp.gt.f32.partialorder %v744_v1, 0.5  ;;  %s397_s26 = sshll.u32 %s195_s25, 4  ;;  %s779_s29 = scalar_lea.hbm %s828_s2, %s488_s24  ;;  %s781_s26 = int_to_ptr.vmem [resolvable:$true] %s397_s26 }
  0x20   : > { %v493_v3 = vunpack.c.l.bf16 %v492_v2  ;;  %v494_v4 = vunpack.c.h.bf16 %v492_v2  ;;  %vm316_vm7 = vmand %vm242_vm3, %vm314_vm4  ;;  %s580_s3 = scalar_lea.vmem %s781_s26, 128  ;;  %s665_s12 = smov [#allocation2]  }
  0x21   : > { %v496_v9 = vcvt.f32.s32 %v495_v5  ;;  %v498_v11 = vcvt.f32.s32 %v497_v10  ;;  %vm315_vm8 = vmand %vm241_vm5, %vm313_vm6  ;;  %v348_v43 = vsel %vm316_vm7, 1.0, %v663_v41  ;;  %p581_p13 = scmp.ne.s32.totalorder %s781_s26, %s580_s3  ;;  %s584_s4 = sshll.u32 %s665_s12, 4  ;;  %s585_s4 = int_to_ptr.vmem [resolvable:$false] %s584_s4 }
  0x22   : > { %v244_v7 = vsel %vm243_vm0, %v493_v3, -inf  ;;  %v247_v8 = vsel %vm243_vm0, %v494_v4, -inf  ;;  %v347_v42 = vsel %vm315_vm8, 1.0, %v663_v41  ;;  %p587_p2 = scmp.lt.s32.totalorder %s781_s26, %s585_s4 }
  0x23   : > { %245 = vmax.xlane.f32.xlu1 %v244_v7  ;;  %305 = vrot.lane.b32.xlu0 %v230_v6, %s661_s5  ;;  %v567_v46 = vpack.i.bf16 %v348_v43, %v347_v42  ;;  %p582_p0 = pnand %p581_p13, %p721_p4  ;;  %s586_s5 = scalar_lea.vmem %s585_s4, 256 }
  0x24   : > { %p588_p3 = scmp.lt.s32.totalorder %s586_s5, %s580_s3 }
  0x25   : > { %p583_p1 = pneg %p582_p0 }
  0x26   : > { %p589_p5 = por %p588_p3, %p587_p2 }
  0x27   : > { %248 = vmax.xlane.f32.xlu1 %v247_v8  ;;  %265 = vperm.xlu0 %565, %v496_v9  }
  0x28   : > { %p590_p6 = pnand %p589_p5, %p583_p1 }
  0x38   : > { %268 = vperm.xlu1 %566, %v498_v11  }
  0x91   : > { %v304_v12 = vpop.permute.xlu0 %303 }
  0x92   : > { %v309_v13 = vsub.f32 %v744_v1, %v304_v12 }
  0x94   : > { %v311_v14 = vmul.f32 %v309_v13, %v309_v13 }
  0x95   : > { %v306_v15 = vpop.permute.xlu0 %305 }
  0x96   : > { %v310_v16 = vsub.f32 %v230_v6, %v306_v15  ;;  %319 = vrot.lane.b32.xlu0 %v311_v14, %s662_s6 }
  0x98   : > { %v312_v17 = vmul.f32 %v310_v16, %v310_v16 }
  0x9a   : > { %321 = vrot.lane.b32.xlu0 %v312_v17, %s662_s6 }
  0xa6   : > { %v266_v20 = vpop.permute.xlu0 %265 }
  0xa7   : > { %vm270_vm1 = vcmp.eq.s32.totalorder %v263_v19, %v266_v20 }
  0xb0   : > { %v246_v21 = vpop.xlane.xlu1 %245 }
  0xb1   : > { %v250_v22 = vsub.f32 %v493_v3, %v246_v21 }
  0xb3   : > { %v252_v23 = vmul.f32 1.442695, %v250_v22  ;;  %v272_v25 = vsel %vm270_vm1, %v250_v22, 0.0 }
  0xb4   : > { %v249_v24 = vpop.xlane.xlu1 %248  ;;  %v274_v28 = vsel %vm243_vm0, %v272_v25, 0.0 }
  0xb5   : > { %572 = vpow2.f32 %v252_v23  ;;  %v251_v26 = vsub.f32 %v494_v4, %v249_v24 }
  0xb7   : > { %v254_v27 = vmul.f32 1.442695, %v251_v26 }
  0xb8   : > { %v269_v29 = vpop.permute.xlu1 %268 }
  0xb9   : > { %574 = vpow2.f32 %v254_v27  ;;  %vm271_vm2 = vcmp.eq.s32.totalorder %v263_v19, %v269_v29  ;;  %275 = vadd.xlane.f32.xlu0 %v274_v28 }
  0xba   : > { %v273_v30 = vsel %vm271_vm2, %v251_v26, 0.0 }
  0xbb   : > { %v277_v31 = vsel %vm243_vm0, %v273_v30, 0.0 }
  0xbd   : > { %278 = vadd.xlane.f32.xlu0 %v277_v31 }
  0xbf   : > { %v573_v32 = vpop.eup %572 }
  0xc0   : > { %v256_v33 = vsel %vm243_vm0, %v573_v32, 0.0 }
  0xc1   : > { %257 = vadd.xlane.f32.xlu0 %v256_v33 }
  0xc3   : > { %v575_v34 = vpop.eup %574 }
  0xc4   : > { %v259_v35 = vsel %vm243_vm0, %v575_v34, 0.0 }
  0xc5   : > { %260 = vadd.xlane.f32.xlu1 %v259_v35 }
 0x108   : > { %v320_v44 = vpop.permute.xlu0 %319 }
 0x109   : > { %v325_v45 = vsel %vm315_vm8, %v320_v44, 0.0 }
 0x10a   : > { %329 = vrot.lane.b32.xlu1 %v325_v45, %s664_s8 }
 0x10c   : > { %v322_v47 = vpop.permute.xlu0 %321 }
 0x10d   : > { %v326_v48 = vsel %vm316_vm7, %v322_v47, 0.0 }
 0x10e   : > { %331 = vrot.lane.b32.xlu0 %v326_v48, %s664_s8  ;;  %568 = vrot.lane.b32.xlu1 %v567_v46, %s664_s8 }
 0x146   : > { %v276_v49 = vpop.xlane.xlu0 %275 }
 0x14a   : > { %v279_v50 = vpop.xlane.xlu0 %278 }
 0x14e   : > { %v258_v51 = vpop.xlane.xlu0 %257 }
 0x14f   : > { %576 = vlog2.f32 %v258_v51 }
 0x152   : > { %v261_v52 = vpop.xlane.xlu1 %260 }
 0x153   : > { %578 = vlog2.f32 %v261_v52 }
 0x159   : > { %v577_v53 = vpop.eup %576 }
 0x15a   : > { %v281_v54 = vmul.f32 0.6931472, %v577_v53 }
 0x15c   : > { %v284_v56 = vsub.f32 %v281_v54, %v276_v49 }
 0x15d   : > { %v579_v55 = vpop.eup %578 }
 0x15e   : > { %v283_v57 = vmul.f32 0.6931472, %v579_v55  ;;  %v286_v58 = vsel %vm241_vm5, %v284_v56, 0.0 }
 0x15f   : > { %v289_v60 = vsel %vm288_vm9, %v286_v58, 0.0 }
 0x160   : > { %v285_v59 = vsub.f32 %v283_v57, %v279_v50 }
 0x162   : > { %v287_v61 = vsel %vm242_vm3, %v285_v59, 0.0 }
 0x163   : > { %v290_v62 = vsel %vm288_vm9, %v287_v61, 0.0 }
 0x164   : > { %v291_v63 = vadd.f32 %v290_v62, %v289_v60 }
 0x166   : > { %292 = vadd.xlane.f32.xlu1 %v291_v63 }
 0x17c   : > { %v330_v0 = vpop.permute.xlu1 %329 }
 0x17d   : > { %v335_v3 = vsel %vm288_vm9, %v330_v0, 0.0 }
 0x180   : > { %v332_v1 = vpop.permute.xlu0 %331  ;;  %v569_v2 = vpop.permute.xlu1 %568 }
 0x181   : > { %v336_v4 = vsel %vm288_vm9, %v332_v1, 0.0  ;;  %v571_v5 = vunpack.i.h.bf16 %v569_v2  ;;  %v570_v6 = vunpack.i.l.bf16 %v569_v2 }
 0x182   : > { %v337_v7 = vadd.f32 %v336_v4, %v335_v3 }
 0x183   : > { %v357_v8 = vsel %vm288_vm9, %v570_v6, 0.0  ;;  %v358_v9 = vsel %vm288_vm9, %v571_v5, 0.0 }
 0x184   : > { %338 = vadd.xlane.f32.xlu0 %v337_v7  ;;  %v359_v10 = vadd.f32 %v358_v9, %v357_v8 }
 0x188   : > { %360 = vadd.xlane.f32.xlu0 %v359_v10 }
 0x1f3   : > { %v293_v11 = vpop.xlane.xlu1 %292 }
 0x1f4   : > { %v294_v12 = vrot.slane %v293_v11, 4 }
 0x1f6   : > { %v295_v13 = vadd.f32 %v294_v12, %v293_v11 }
 0x1f8   : > { %v296_v14 = vrot.slane %v295_v13, 2 }
 0x1fa   : > { %v297_v15 = vadd.f32 %v296_v14, %v295_v13 }
 0x1fc   : > { %v298_v16 = vrot.slane %v297_v15, 1 }
 0x1fe   : > { %v299_v17 = vadd.f32 %v298_v16, %v297_v15 }
 0x200   : > { %499 = vpush %v299_v17 }
 0x211   : > { %v339_v18 = vpop.xlane.xlu0 %338 }
 0x212   : > { %v340_v19 = vrot.slane %v339_v18, 4 }
 0x214   : > { %v341_v20 = vadd.f32 %v340_v19, %v339_v18 }
 0x215   : > { %v361_v21 = vpop.xlane.xlu0 %360 }
 0x216   : > { %v342_v22 = vrot.slane %v341_v20, 2  ;;  %v362_v23 = vrot.slane %v361_v21, 4 }
 0x218   : > { %v363_v24 = vadd.f32 %v362_v23, %v361_v21  ;;  %v343_v25 = vadd.f32 %v342_v22, %v341_v20 }
 0x21a   : > { %v364_v26 = vrot.slane %v363_v24, 2  ;;  %v344_v27 = vrot.slane %v343_v25, 1 }
 0x21c   : > { %v365_v28 = vadd.f32 %v364_v26, %v363_v24  ;;  %v345_v29 = vadd.f32 %v344_v27, %v343_v25 }
 0x21e   : > { %501 = vpush %v345_v29  ;;  %v366_v30 = vrot.slane %v365_v28, 1 }
 0x220   : > { %v367_v31 = vadd.f32 %v366_v30, %v365_v28 }
 0x222   : > { %503 = vpush %v367_v31 }
 0x231   : > { %s500_s16 = spop %499 }
 0x232   : > { %v370_v32 = vstv %s500_s16 }
 0x233   : > { %v371_v35 = vsel %vm369_vm11, %v370_v32, 0.0 }
 0x24f   : > { %s502_s18 = spop %501 }
 0x250   : > { %v373_v33 = vstv %s502_s18 }
 0x251   : > { %v374_v34 = vsel %vm372_vm10, %v373_v33, 0.0 }
 0x252   : > { %v375_v37 = vadd.f32 %v374_v34, %v371_v35 }
 0x253   : > { %s504_s23 = spop %503 }
 0x254   : > { %v377_v38 = vstv %s504_s23 }
 0x255   : > { %v378_v39 = vsel %vm376_vm12, %v377_v38, 0.0 }
 0x256   : > { %v379_v40 = vadd.f32 %v378_v39, %v375_v37 }
 0x258   : > { %382 = vst [vmem:[%s195_s25] sm:$0xff] %v379_v40 }
 0x259   : > { %593 = shalt.err (!%p590_p6)
}
 0x25a   : > { %s594_s6 = scalar_lea.hbm %s779_s29, 128  ;;  %s598_s15 = scalar_lea.hbm %s828_s2, 256 }
 0x25b   : > { %p595_p7 = scmp.ne.s32.totalorder %s779_s29, %s594_s6  ;;  %p599_p11 = scmp.lt.u32.totalorder %s779_s29, %s828_s2 }
 0x25c   : > { %p600_p12 = scmp.lt.u32.totalorder %s598_s15, %s594_s6  ;;  %p602_p0 = scmp.lt.u32.totalorder %s594_s6, %s779_s29 }
 0x25d   : > { %p596_p9 = pnand %p595_p7, %p721_p4 }
 0x25e   : > { %p601_p13 = por %p600_p12, %p599_p11 }
 0x25f   : > { %p597_p10 = pneg %p596_p9 }
 0x260   : > { %p603_p1 = por %p602_p0, %p601_p13 }
 0x262   : > { %p604_p2 = pnand %p603_p1, %p597_p10 }
 0x264   : > { %607 = shalt.err (!%p604_p2)
}
 0x265   : > { %505 = dma.vmem_to_hbm [thread:$0]  (%p721_p4), %s781_s26, 128, %s779_s29, %s384_s30  }
 0x266 PF: > { %p511_p3 = scmp.ge.s32.totalorder %s658_s14, 2  ;;  %s409_s20 = sand.u32 1, %s638_s9  }
 0x267   : > { %s410_s23 = scalar_lea.sflag [#allocation3], %s409_s20 }
 0x268   : > { %p508_p5 = pnand %p511_p3, %p728_p8 }
 0x26a   : > { %633 = dma.done.wait (!%p508_p5), %s410_s23, 128  }
 0x26b   : > { %635 = vsyncadd (!%p508_p5), %s410_s23, 4294967168  ;;  %s15_s14 = sadd.s32 1, %s658_s14   ;;  %s831_s9 = smov %s642_s10 }
 0x26c   : > { %p12_p6 = scmp.ge.s32.totalorder %s15_s14, 4   ;;  %s832_s10 = smov %s646_s11 }
 0x26d   : > { %s833_s11 = smov %s734_s22  ;;  %s834_s12 = smov %s654_s13 }
 0x26e   : > { %s835_s13 = smov %s837_s17  ;;  %14 = sbr.rel (!%p12_p6) target bundleno = 4 (0x4), region = 70 }
 0x275   :  { %415 = vsyncpa [#allocation3], 1 }
 0x276   :  { %417 = vsyncpa [#allocation3 + $0x1], 1 }

</bundles_post_ra>
